<compile_context>
chip_gen: v7x
topology: tpu7x:2x2x1
jax: 0.10.0
libtpu: 0.0.40
codegen_flags: <defaults>
</compile_context>

<pallas_src>
import math
import numpy as np
import jax
import jax.numpy as jnp
from jax.experimental import pallas as pl
from jax.experimental.pallas import tpu as pltpu


# ----------------------------------------------------------------------------
# normalize2mom: cst = E_{z~N(0,1)}[act(z)^2]^(-1/2), computed deterministically
# with Gauss-Hermite quadrature (host-side, trace time).
# ----------------------------------------------------------------------------
_GH_X, _GH_W = np.polynomial.hermite.hermgauss(128)
_GH_Z = np.sqrt(2.0) * _GH_X


def _normalize2mom_const(act):
    vals = np.asarray(act(jnp.asarray(_GH_Z, dtype=jnp.float32)), dtype=np.float64)
    m2 = float(np.sum(_GH_W * vals ** 2) / np.sqrt(np.pi))
    cst = m2 ** (-0.5)
    if abs(cst - 1.0) < 1e-4:
        cst = 1.0
    return cst


def _act_parity(act):
    """Return +1 (even), -1 (odd) or 0 (neither), like the torch module."""
    x = jnp.linspace(0.0, 10.0, 256)
    a1 = np.asarray(act(x), dtype=np.float64)
    a2 = np.asarray(act(-x), dtype=np.float64)
    if np.max(np.abs(a1 - a2)) < 1e-5:
        return 1
    if np.max(np.abs(a1 + a2)) < 1e-5:
        return -1
    return 0


def _bf16_compute_ok():
    # v6e / v7x have bf16 VPU/EUP; keep f32 activation math on older chips.
    try:
        kind = jax.devices()[0].device_kind.lower()
        return not any(t in kind for t in ("v2", "v3", "v4", "v5"))
    except Exception:
        return False


# ----------------------------------------------------------------------------
# Activation "module": irreps_in is a list of (mul, (l, p)); acts a matching
# list of callables or None.
# ----------------------------------------------------------------------------
class Activation:
    def __init__(self, irreps_in, acts):
        if len(irreps_in) != len(acts):
            raise ValueError("Irreps in and number of activation functions does not match")
        self.irreps_in = irreps_in
        self.acts = acts
        self.paths = []      # (start, width, act_or_None, cst)
        irreps_out = []
        idx = 0
        for (mul, (l_in, p_in)), act in zip(irreps_in, acts):
            ir_dim = 2 * l_in + 1
            if act is not None:
                if l_in != 0:
                    raise ValueError("Activation: cannot apply an activation to a non-scalar input.")
                p_act = _act_parity(act)
                p_out = p_act if p_in == -1 else p_in
                if p_out == 0:
                    raise ValueError("Activation: the parity is violated!")
                irreps_out.append((mul, (0, p_out)))
                cst = _normalize2mom_const(act)
                self.paths.append((idx, mul, act, cst))
                idx += mul
            else:
                irreps_out.append((mul, (l_in, p_in)))
                self.paths.append((idx, mul * ir_dim, None, 1.0))
                idx += mul * ir_dim
        self.irreps_out = irreps_out
        self.dim = idx
        C = self.dim

        # Group activated segments by distinct activation function so the kernel
        # performs one full-width act eval per distinct act, selected with a
        # trace-time-constant per-channel group-id row (no per-tile iota).
        self._act_groups = []          # list of (act, cst)
        gid_c = np.zeros((max(C, 1),), np.int32)
        key_to_g = {}
        for start, width, act, cst in self.paths:
            if act is None:
                continue
            key = id(act)
            if key not in key_to_g:
                key_to_g[key] = len(self._act_groups)
                self._act_groups.append((act, cst))
            gid_c[start:start + width] = key_to_g[key] + 1

        self._gid_base = gid_c[:max(C, 1)].reshape(1, max(C, 1))
        # lane-dense replication factor: smallest k with (k*C) % 128 == 0
        self._lane_k = 128 // math.gcd(max(C, 1), 128)
        self._gid_dense = np.tile(gid_c[:max(C, 1)], self._lane_k).reshape(1, self._lane_k * max(C, 1))
        self._single_full_group = (len(self._act_groups) == 1 and C > 0 and bool(np.all(gid_c[:C] == 1)))
        self._bf16_ok = _bf16_compute_ok()

    # ---------------- Pallas kernel ----------------
    def _make_kernel(self, out_dtype, compute_dtype):
        groups = self._act_groups
        full_cover = self._single_full_group

        def kernel(gid_ref, x_ref, o_ref):
            x = x_ref[...]
            y = x  # passthrough baseline (act=None / l>0 channels)
            if groups:
                xc = x if x.dtype == compute_dtype else x.astype(compute_dtype)
                if full_cover:
                    act, cst = groups[0]
                    a = act(xc)
                    if cst != 1.0:
                        a = a * jnp.asarray(cst, dtype=compute_dtype)
                    y = a.astype(out_dtype)
                else:
                    gid = gid_ref[...]                      # (1, W) int32, constant row
                    for g, (act, cst) in enumerate(groups):
                        a = act(xc)
                        if cst != 1.0:
                            a = a * jnp.asarray(cst, dtype=compute_dtype)
                        a = a.astype(out_dtype)
                        m = gid == jnp.int32(g + 1)          # (1, W) -> broadcasts over rows
                        y = jnp.where(m, a, y)
            o_ref[...] = y  # ONE full-tile, lane-dense store

        return kernel

    # ---------------- tiling heuristic ----------------
    @staticmethod
    def _pick_block_rows(R, W, itemsize, override=None):
        # sublane alignment: 8 rows for f32, 16 for bf16, 32 for int8/fp8
        sub = max(8, 32 // max(1, itemsize))
        if override is not None:
            br = max(1, int(override))
            if br >= R:
                return R
            return max(sub, (br // sub) * sub)
        if R <= 2 * sub:
            return R                       # tiny input: one full block
        # ~1.5 MiB per (double-buffered) block buffer -> ~85% of HBM roofline,
        # comfortably under every generation's scoped VMEM default.
        target_bytes = 3 * 512 * 1024
        rows_by_bytes = max(sub, target_bytes // max(1, W * itemsize))
        # keep >=2 (>=4 when possible) grid steps: v7x megacore + DMA overlap
        min_blocks = 4 if R >= 4 * sub else 2
        rows_cap = max(sub, -(-R // min_blocks))
        br = min(rows_by_bytes, rows_cap)
        return max(sub, (br // sub) * sub)

    # ---------------- wrapper ----------------
    def __call__(self, features, block_rows=None):
        # features: (..., C) with C == self.dim (dim=-1 semantics of torch module)
        if len(self.paths) == 0:
            return jnp.zeros_like(features)
        C = self.dim
        assert features.shape[-1] == C, (features.shape, C)
        if not self._act_groups:
            return features               # identity (all segments pass through)

        lead = features.shape[:-1]
        rows = int(np.prod(lead)) if lead else 1
        if rows == 0:
            return features
        dtype = features.dtype
        itemsize = jnp.dtype(dtype).itemsize

        # Lane-dense view: (rows, C) -> (rows/k, k*C) is a free contiguous
        # reshape whenever rows % k == 0 (no wrapper-side pad/copy needed).
        k = self._lane_k
        use_dense = (rows % k == 0) and (k * C <= 16384) and (k * C >= C)
        if use_dense:
            W, R, gid_np = k * C, rows // k, self._gid_dense
        else:
            W, R, gid_np = C, rows, self._gid_base

        x2 = features.reshape(R, W)
        gid = jnp.asarray(gid_np, dtype=jnp.int32)          # (1, W) constant row

        if dtype == jnp.bfloat16:
            compute_dtype = jnp.bfloat16 if self._bf16_ok else jnp.float32
        elif dtype == jnp.float32:
            compute_dtype = jnp.float32
        else:
            compute_dtype = jnp.float32

        br = self._pick_block_rows(R, W, itemsize, override=block_rows)
        grid = (pl.cdiv(R, br),)

        kernel = self._make_kernel(dtype, compute_dtype)
        out = pl.pallas_call(
            kernel,
            out_shape=jax.ShapeDtypeStruct((R, W), dtype),
            grid=grid,
            in_specs=[
                pl.BlockSpec((1, W), lambda i: (0, 0)),      # tiny constant gid row
                pl.BlockSpec((br, W), lambda i: (i, 0)),
            ],
            out_specs=pl.BlockSpec((br, W), lambda i: (i, 0)),
            compiler_params=pltpu.CompilerParams(
                dimension_semantics=("parallel",)),
        )(gid, x2)
        return out.reshape(features.shape)

    # pure-JAX reference (for correctness check)
    def reference(self, features):
        outs = []
        for start, width, act, cst in self.paths:
            seg = features[..., start:start + width]
            if act is None:
                outs.append(seg)
            else:
                outs.append((act(seg.astype(jnp.float32)) * cst).astype(features.dtype))
        return jnp.concatenate(outs, axis=-1)


if __name__ == "__main__":
    # irreps_in = "16x0e + 16x0o + 8x1o", acts = [silu, tanh, None]
    # channel dim C = 16 + 16 + 8*3 = 56 ; lane-dense k = 128/gcd(56,128) = 16
    irreps_in = [(16, (0, 1)), (16, (0, -1)), (8, (1, -1))]
    acts = [jax.nn.silu, jnp.tanh, None]
    module = Activation(irreps_in, acts)

    key = jax.random.PRNGKey(0)
    k1, k2, k3, k4, k5 = jax.random.split(key, 5)

    # test 1: small input, lane-dense path (rows=16 divisible by k=16), single block
    x1 = jax.random.normal(k1, (2, 8, module.dim), dtype=jnp.float32)
    out1 = jax.block_until_ready(module(x1))
    np.testing.assert_allclose(np.asarray(out1), np.asarray(module.reference(x1)),
                               rtol=1e-5, atol=1e-5)

    # test 2: rows=21 not divisible by k -> fallback (rows, C) path, forced small
    # block so the grid has an overhanging (masked) tail block.
    x2 = jax.random.normal(k2, (3, 7, module.dim), dtype=jnp.float32)
    out2 = jax.block_until_ready(module(x2, block_rows=8))
    np.testing.assert_allclose(np.asarray(out2), np.asarray(module.reference(x2)),
                               rtol=1e-5, atol=1e-5)

    # test 3: moderate input, lane-dense multi-block path via the size heuristic
    # (rows=2048 -> R=128 rows of width 896, >=4 grid steps).
    x3 = jax.random.normal(k3, (2, 1024, module.dim), dtype=jnp.float32)
    out3 = jax.block_until_ready(module(x3))
    np.testing.assert_allclose(np.asarray(out3), np.asarray(module.reference(x3)),
                               rtol=1e-5, atol=1e-5)

    # test 4: bf16 input (bf16 activation math on v6e/v7x, f32 on older chips)
    x4 = jax.random.normal(k4, (2, 8, module.dim), dtype=jnp.bfloat16)
    out4 = jax.block_until_ready(module(x4))
    np.testing.assert_allclose(np.asarray(out4.astype(jnp.float32)),
                               np.asarray(module.reference(x4).astype(jnp.float32)),
                               rtol=5e-2, atol=1e-1)

    # test 5: single activation covering every channel (full-cover fast path)
    module_full = Activation([(16, (0, 1))], [jnp.tanh])
    x5 = jax.random.normal(k5, (2, 8, module_full.dim), dtype=jnp.float32)
    out5 = jax.block_until_ready(module_full(x5))
    np.testing.assert_allclose(np.asarray(out5), np.asarray(module_full.reference(x5)),
                               rtol=1e-5, atol=1e-5)

    print("KERNEL_OK")
</pallas_src>

<mosaic_0001>
module attributes {stable_mosaic.version = 11 : i64} {
  func.func @kernel(%arg0: i32, %arg1: memref<1x896xi32, #tpu.memory_space<vmem>>, %arg2: memref<1x896xf32, #tpu.memory_space<vmem>>, %arg3: memref<1x896xf32, #tpu.memory_space<vmem>>) attributes {dimension_semantics = [#tpu.dimension_semantics<parallel>], iteration_bounds = array<i64: 1>, scalar_prefetch = 0 : i64, scratch_operands = 0 : i64, tpu.core_type = #tpu.core_type<tc>, window_params = [{pipeline_mode = #tpu.pipeline_mode<synchronous>, transform_indices = @transform_0, window_bounds = array<i64: 1, 896>}, {transform_indices = @transform_1, window_bounds = array<i64: 1, 896>}, {transform_indices = @transform_2, window_bounds = array<i64: 1, 896>}]} {
    %c0 = arith.constant 0 : index
    %c0_0 = arith.constant 0 : index
    %0 = vector.load %arg2[%c0, %c0_0] : memref<1x896xf32, #tpu.memory_space<vmem>>, vector<1x896xf32>
    %c0_1 = arith.constant 0 : index
    %c0_2 = arith.constant 0 : index
    %1 = vector.load %arg1[%c0_1, %c0_2] : memref<1x896xi32, #tpu.memory_space<vmem>>, vector<1x896xi32>
    %2 = arith.negf %0 : vector<1x896xf32>
    %3 = math.exp %2 : vector<1x896xf32>
    %cst = arith.constant 1.000000e+00 : f32
    %4 = vector.broadcast %cst : f32 to vector<1x896xf32>
    %5 = arith.addf %4, %3 : vector<1x896xf32>
    %6 = arith.divf %4, %5 : vector<1x896xf32>
    %7 = arith.mulf %0, %6 : vector<1x896xf32>
    %cst_3 = arith.constant 1.67653251 : f32
    %8 = vector.broadcast %cst_3 : f32 to vector<1x896xf32>
    %9 = arith.mulf %7, %8 : vector<1x896xf32>
    %c1_i32 = arith.constant 1 : i32
    %10 = vector.broadcast %c1_i32 : i32 to vector<1x896xi32>
    %11 = arith.cmpi eq, %1, %10 : vector<1x896xi32>
    %12 = arith.select %11, %9, %0 : vector<1x896xi1>, vector<1x896xf32>
    %13 = math.tanh %0 : vector<1x896xf32>
    %cst_4 = arith.constant 1.5925374 : f32
    %14 = vector.broadcast %cst_4 : f32 to vector<1x896xf32>
    %15 = arith.mulf %13, %14 : vector<1x896xf32>
    %c2_i32 = arith.constant 2 : i32
    %16 = vector.broadcast %c2_i32 : i32 to vector<1x896xi32>
    %17 = arith.cmpi eq, %1, %16 : vector<1x896xi32>
    %18 = arith.select %17, %15, %12 : vector<1x896xi1>, vector<1x896xf32>
    %c0_5 = arith.constant 0 : index
    %c0_6 = arith.constant 0 : index
    %19 = vector.load %arg3[%c0_5, %c0_6] : memref<1x896xf32, #tpu.memory_space<vmem>>, vector<1x896xf32>
    tpu.vector_store %arg3[%c0_5, %c0_6], %18 {strides = array<i32>} : memref<1x896xf32, #tpu.memory_space<vmem>>, vector<1x896xf32>,
    return
  }
  func.func @transform_0(%arg0: i32) -> (i32, i32) {
    %c0_i32 = arith.constant 0 : i32
    %c0_i32_0 = arith.constant 0 : i32
    %c0_i32_1 = arith.constant 0 : i32
    return %c0_i32, %c0_i32_0 : i32, i32
  }
  func.func @transform_1(%arg0: i32) -> (i32, i32) {
    %c0_i32 = arith.constant 0 : i32
    %c0_i32_0 = arith.constant 0 : i32
    return %arg0, %c0_i32 : i32, i32
  }
  func.func @transform_2(%arg0: i32) -> (i32, i32) {
    %c0_i32 = arith.constant 0 : i32
    %c0_i32_0 = arith.constant 0 : i32
    return %arg0, %c0_i32 : i32, i32
  }
}

</mosaic_0001>

<bundles_post_ra>
// kernel: tpu_custom_call.1
= control target key start
LH: loop header
LB: loop body
LE: loop exit
PB: predicated region body
PF: predicated region fallthrough
CT: control target
= control target key end

     0   :  { %7 = vsyncpa [#allocation3], 0  ;;  %s209_s0 = inlined_call_operand.hbm [shape: s32[1,896], index: 0, kind: input, shape index: {}]   ;;  %s210_s1 = inlined_call_operand.hbm [shape: f32[1,896], index: 1, kind: input, shape index: {}]   ;;  %s211_s2 = inlined_call_operand.hbm [shape: f32[1,896], index: 2, kind: output, shape index: {}]  }
   0x1   :  { %8 = vsyncpa [#allocation6], 0 }
   0x2   :  { %9 = vsyncpa [#allocation4], 0  ;;  %s155_s9 = smov [#allocation2]   ;;  %s156_s11 = smov [#allocation5]  }
   0x3   :  { %s16_s10 = sshll.u32 %s155_s9, 4  ;;  %s26_s12 = sshll.u32 %s156_s11, 4  ;;  %s17_s10 = int_to_ptr.vmem [resolvable:$true] %s16_s10  ;;  %s27_s12 = int_to_ptr.vmem [resolvable:$true] %s26_s12 }
   0x4   :  { %s83_s15 = scalar_lea.hbm %s209_s0, 112 }
   0x5   :  { %p84_p0 = scmp.ne.s32.totalorder %s209_s0, %s83_s15  ;;  %p87_p1 = scmp.lt.u32.totalorder %s83_s15, %s209_s0 }
   0x7   :  { %p89_p2 = pnand %p87_p1, %p84_p0 }
   0x9   :  { %92 = shalt.err (!%p89_p2)
}
   0xa   :  { %s93_s20 = scalar_lea.vmem %s17_s10, 112  ;;  %s97_s21 = scalar_lea.vmem %s17_s10, 128 }
   0xb   :  { %p94_p3 = scmp.ne.s32.totalorder %s17_s10, %s93_s20  ;;  %p98_p4 = scmp.lt.s32.totalorder %s17_s10, %s17_s10 }
   0xc   :  { %p99_p5 = scmp.lt.s32.totalorder %s97_s21, %s93_s20 }
   0xe   :  { %p100_p6 = por %p99_p5, %p98_p4 }
  0x10   :  { %p101_p7 = pnand %p100_p6, %p94_p3 }
  0x12   :  { %104 = shalt.err (!%p101_p7)
}
  0x13   :  { %19 = dma.hbm_to_vmem [thread:$0]  %s209_s0, 112, %s17_s10, [#allocation3]  }
  0x14   :  { %s105_s26 = scalar_lea.hbm %s210_s1, 112 }
  0x15   :  { %p106_p8 = scmp.ne.s32.totalorder %s210_s1, %s105_s26  ;;  %p109_p9 = scmp.lt.u32.totalorder %s105_s26, %s210_s1 }
  0x17   :  { %p111_p10 = pnand %p109_p9, %p106_p8 }
  0x19   :  { %114 = shalt.err (!%p111_p10)
}
  0x1a   :  { %s115_s3 = scalar_lea.vmem %s27_s12, 112  ;;  %s119_s4 = scalar_lea.vmem %s27_s12, 128 }
  0x1b   :  { %p116_p11 = scmp.ne.s32.totalorder %s27_s12, %s115_s3  ;;  %p120_p12 = scmp.lt.s32.totalorder %s27_s12, %s27_s12 }
  0x1c   :  { %p121_p13 = scmp.lt.s32.totalorder %s119_s4, %s115_s3 }
  0x1e   :  { %p122_p0 = por %p121_p13, %p120_p12 }
  0x20   :  { %p123_p1 = pnand %p122_p0, %p116_p11 }
  0x22   :  { %126 = shalt.err (!%p123_p1)
}
  0x23   :  { %29 = dma.hbm_to_vmem [thread:$0]  %s210_s1, 112, %s27_s12, [#allocation6]  }
  0x24   :  { %149 = dma.done.wait [#allocation3], 112  }
  0x25   :  { %150 = vsyncadd [#allocation3], 4294967184 }
  0x26   :  { %151 = dma.done.wait [#allocation6], 112  }
  0x27   :  { %152 = vsyncadd [#allocation6], 4294967184  ;;  %v36_v0 = vld [vmem:[#allocation5] sm:$0xff]  ;;  %v37_v5 = vld [vmem:[#allocation2] sm:$0xff]  ;;  %v52_v7 = vlaneseq  ;;  %s157_s6 = smov [#allocation7]  }
  0x28   :  { %v73_v1 = vmul.f32 -1.442695, %v36_v0  ;;  %vm46_vm0 = vcmp.eq.s32.totalorder %v37_v5, 1  ;;  %s63_s1 = sshll.u32 %s157_s6, 4  ;;  %vm50_vm1 = vcmp.eq.s32.totalorder %v37_v5, 2  ;;  %s64_s1 = int_to_ptr.vmem [resolvable:$true] %s63_s1 }
  0x29   :  { %vm54_vm2 = vcmp.lt.s32.totalorder %v52_v7, 896  ;;  %s127_s7 = scalar_lea.vmem %s64_s1, 112  ;;  %s131_s8 = scalar_lea.vmem %s64_s1, 128 }
  0x2a   :  { %77 = vpow2.f32 %v73_v1  ;;  %p128_p2 = scmp.ne.s32.totalorder %s64_s1, %s127_s7  ;;  %p132_p3 = scmp.lt.s32.totalorder %s64_s1, %s64_s1 }
  0x2b   :  { %79 = vtanh.f32 %v36_v0  ;;  %p133_p4 = scmp.lt.s32.totalorder %s131_s8, %s127_s7 }
  0x2d   :  { %p134_p5 = por %p133_p4, %p132_p3 }
  0x2f   :  { %p135_p6 = pnand %p134_p5, %p128_p2 }
  0x34   :  { %v78_v2 = vpop.eup %77 }
  0x35   :  { %v41_v3 = vadd.f32 1.0, %v78_v2  ;;  %v80_v4 = vpop.eup %79 }
  0x36   :  { %v49_v9 = vmul.f32 1.5925374, %v80_v4 }
  0x37   :  { %81 = vrcp.f32 %v41_v3 }
  0x41   :  { %v82_v6 = vpop.eup %81 }
  0x42   :  { %v44_v8 = vmul.f32 %v82_v6, %v36_v0 }
  0x44   :  { %v45_v10 = vmul.f32 1.6765325, %v44_v8 }
  0x46   :  { %v47_v11 = vsel %vm46_vm0, %v45_v10, %v36_v0 }
  0x47   :  { %v51_v12 = vsel %vm50_vm1, %v49_v9, %v47_v11 }
  0x48   :  { %56 = vst.msk [vmem:[#allocation7] sm:$0x7f] %vm54_vm2, %v51_v12 }
  0x49   :  { %138 = shalt.err (!%p135_p6)
}
  0x4a   :  { %s139_s11 = scalar_lea.hbm %s211_s2, 112 }
  0x4b   :  { %p140_p7 = scmp.ne.s32.totalorder %s211_s2, %s139_s11  ;;  %p143_p8 = scmp.lt.u32.totalorder %s139_s11, %s211_s2 }
  0x4d   :  { %p145_p9 = pnand %p143_p8, %p140_p7 }
  0x4f   :  { %148 = shalt.err (!%p145_p9)
}
  0x50   :  { %66 = dma.vmem_to_hbm [thread:$0]  %s64_s1, 112, %s211_s2, [#allocation4]  }
  0x51   :  { %153 = dma.done.wait [#allocation4], 112  }
  0x52   :  { %154 = vsyncadd [#allocation4], 4294967184 }
  0x53   :  { %70 = vsyncpa [#allocation3], 1 }
  0x54   :  { %71 = vsyncpa [#allocation6], 1 }
  0x55   :  { %72 = vsyncpa [#allocation4], 1 }

</bundles_post_ra>
